<compile_context>
chip_gen: v7x
topology: tpu7x:2x2x1
jax: 0.10.0
libtpu: 0.0.40
codegen_flags: <defaults>
</compile_context>

<pallas_src>
import functools

import jax
import jax.numpy as jnp
from jax.experimental import pallas as pl
from jax.experimental.pallas import tpu as pltpu


def _dino_loss_kernel(inv_ttemp_ref, teacher_ref, center_ref, student_ref,
                      loss_ref, center_sum_ref, probs_ref, acc_ref, *,
                      inv_student_temp, neg_inv_scale, probs_dtype):
    v = pl.program_id(1)

    # log_softmax(student_crop_v / student_temp, axis=-1) -- needed at every step.
    s = student_ref[0].astype(jnp.float32) * inv_student_temp        # (tb, D)
    m_s = jnp.max(s, axis=-1, keepdims=True)
    lse = jnp.log(jnp.sum(jnp.exp(s - m_s), axis=-1, keepdims=True)) + m_s
    logp = s - lse                                                    # (tb, D)

    # Teacher softmax + partial center sum: once per row block (first crop iteration).
    @pl.when(v == 0)
    def _teacher_block():
        t = teacher_ref[...].astype(jnp.float32)                      # (2, tb, D)
        c = center_ref[...].astype(jnp.float32)                       # (1, D)

        # Partial sum of teacher rows for the center EMA (this row block).
        chunk_sum = t[0] + t[1]                                       # (tb, D)
        center_sum_ref[0] = jnp.sum(chunk_sum, axis=0, keepdims=True)

        # softmax((teacher - center) * (1/temp), axis=-1), fully in-VMEM.
        logits = (t - c) * inv_ttemp_ref[0, 0]
        m_t = jnp.max(logits, axis=-1, keepdims=True)
        e = jnp.exp(logits - m_t)
        denom = jnp.sum(e, axis=-1, keepdims=True)                    # (2, tb, 1)
        q = e * pl.reciprocal(denom, approx=False)                    # (2, tb, D) f32

        # Scratch slot 0: q0 (only needed at v == 1); slot 1: q0 + q1 (every v >= 2).
        probs_ref[0] = q[0].astype(probs_dtype)
        probs_ref[1] = (q[0] + q[1]).astype(probs_dtype)

        # v == 0 cross-term: the v == iq == 0 term is skipped, so only the iq == 1 teacher chunk
        # contributes; q1 is still live in vregs -- no scratch round trip for it.
        acc_ref[...] = jnp.sum(q[1] * logp, axis=0, keepdims=True)

    @pl.when(v == 1)
    def _v1():
        q0 = probs_ref[0].astype(jnp.float32)
        acc_ref[...] = acc_ref[...] + jnp.sum(q0 * logp, axis=0, keepdims=True)

    @pl.when(v >= 2)
    def _vrest():
        q_sum = probs_ref[1].astype(jnp.float32)
        acc_ref[...] = acc_ref[...] + jnp.sum(q_sum * logp, axis=0, keepdims=True)

    # Single cross-lane reduction + scalar store + sign/scale, once per row block.
    @pl.when(v == pl.num_programs(1) - 1)
    def _finalize():
        total = jnp.sum(acc_ref[...], axis=-1, keepdims=True) * neg_inv_scale   # (1, 1)
        loss_ref[...] = total[None]                                              # (1, 1, 1)


def _vmem_limit_bytes():
    """Scoped-VMEM limit derived from the hardware (~70% of per-core VMEM capacity)."""
    try:
        cap = int(pltpu.get_tpu_info().vmem_capacity_bytes)
    except Exception:
        cap = 128 * 1024 * 1024   # conservative default (v5e/v6e figure)
    return int(0.7 * cap)


def _num_tensorcores_per_chip():
    """Best-effort TC count per chip (v7x has 2; v5e/v6e have 1)."""
    try:
        kind = jax.devices()[0].device_kind.lower()
    except Exception:
        return 1
    return 2 if "v7" in kind else 1


def _sublane_align(itemsize):
    return {4: 8, 2: 16, 1: 32}.get(itemsize, 8)


def _pick_row_block(b, out_dim, s_itemsize, t_itemsize, probs_itemsize,
                    limit_bytes, prefer_two_plus_blocks):
    """Largest aligned row block that fits an honest VMEM accounting.

    Per-row footprint: q0/q_sum scratch (2 slots, bf16) + double-buffered teacher (2 chunks)
    + double-buffered student crop + ~4 live f32 (tb, D) temporaries (scaled logits / exp /
    logp on the common path; teacher softmax temporaries at v == 0).
    """
    sublane = _sublane_align(s_itemsize)
    per_row = out_dim * (2 * probs_itemsize          # probs / q_sum scratch
                         + 2 * 2 * t_itemsize        # teacher: 2 chunks, double-buffered
                         + 2 * s_itemsize            # student crop, double-buffered
                         + 4 * 4)                    # live f32 temporaries
    # Fixed footprint: center (double-buffered) + (1, D) f32 accumulator
    # + (1, 1, D) center-sum output (double-buffered).
    fixed = out_dim * 4 * (2 + 1 + 2)
    budget = int(0.55 * limit_bytes) - fixed
    candidates = [d for d in range(1, b + 1)
                  if b % d == 0 and (d % sublane == 0 or d == b)]
    fitting = [d for d in candidates if d * per_row <= budget]
    assert fitting, (
        "DINOLoss Pallas kernel: no row block fits the VMEM budget "
        f"(out_dim={out_dim}, per_row_bytes={per_row}, budget_bytes={budget})")
    if prefer_two_plus_blocks:
        multi = [d for d in fitting if b // d >= 2]
        if multi:
            return max(multi)
    return max(fitting)


def dino_loss_forward(student_output, teacher_output, center, teacher_temp_epoch, *,
                      num_crops, student_temp, center_momentum, row_block=None,
                      probs_dtype=jnp.bfloat16):
    total_rows, out_dim = student_output.shape
    assert total_rows % num_crops == 0
    b = total_rows // num_crops
    assert teacher_output.shape == (2 * b, out_dim)
    assert num_crops >= 2, "DINOLoss needs >= 2 crops (n_loss_terms would be 0)"

    limit = _vmem_limit_bytes()
    probs_itemsize = jnp.dtype(probs_dtype).itemsize
    if row_block is None:
        row_block = _pick_row_block(
            b, out_dim,
            student_output.dtype.itemsize, teacher_output.dtype.itemsize,
            probs_itemsize, limit,
            prefer_two_plus_blocks=_num_tensorcores_per_chip() >= 2)
    sublane = _sublane_align(student_output.dtype.itemsize)
    assert b % row_block == 0 and (row_block % sublane == 0 or row_block == b)
    num_row_blocks = b // row_block

    # Free reshapes: expose crop / chunk structure to the BlockSpecs (no data movement, no casts).
    student = student_output.reshape(num_crops, b, out_dim)
    teacher = teacher_output.reshape(2, b, out_dim)

    inv_ttemp = (1.0 / jnp.asarray(teacher_temp_epoch, jnp.float32)).reshape(1, 1)

    n_loss_terms = 2 * num_crops - 2
    kernel = functools.partial(
        _dino_loss_kernel,
        inv_student_temp=float(1.0 / student_temp),
        neg_inv_scale=float(-1.0 / (b * n_loss_terms)),
        probs_dtype=probs_dtype,
    )

    s_bytes = student_output.dtype.itemsize
    t_bytes = teacher_output.dtype.itemsize
    cost = pl.CostEstimate(
        flops=int(b * out_dim * (5 * num_crops      # student log-softmax
                                 + 16               # teacher softmax + center sum + q_sum build
                                 + 3 * num_crops)), # cross-term multiply + accumulate
        transcendentals=int((num_crops + 2) * b * out_dim),
        bytes_accessed=int(num_crops * b * out_dim * s_bytes
                           + 2 * b * out_dim * t_bytes
                           + out_dim * 4
                           + num_row_blocks * (out_dim + 1) * 4),
    )

    partial_loss, center_rowsum = pl.pallas_call(
        kernel,
        out_shape=(
            jax.ShapeDtypeStruct((num_row_blocks, 1, 1), jnp.float32),        # per-block loss
            jax.ShapeDtypeStruct((num_row_blocks, 1, out_dim), jnp.float32),  # per-block center sum
        ),
        grid=(num_row_blocks, num_crops),
        in_specs=[
            pl.BlockSpec(memory_space=pltpu.MemorySpace.SMEM),                # 1 / teacher_temp
            pl.BlockSpec((2, row_block, out_dim), lambda r, v: (0, r, 0)),    # teacher row block
            pl.BlockSpec((1, out_dim), lambda r, v: (0, 0)),                  # center (resident)
            pl.BlockSpec((1, row_block, out_dim), lambda r, v: (v, r, 0)),    # student crop block
        ],
        out_specs=(
            pl.BlockSpec((1, 1, 1), lambda r, v: (r, 0, 0)),
            pl.BlockSpec((1, 1, out_dim), lambda r, v: (r, 0, 0)),
        ),
        scratch_shapes=[
            pltpu.VMEM((2, row_block, out_dim), probs_dtype),   # q0 / q_sum (bf16)
            pltpu.VMEM((1, out_dim), jnp.float32),              # lane-dense loss accumulator
        ],
        compiler_params=pltpu.CompilerParams(
            dimension_semantics=("parallel", "arbitrary"),
            vmem_limit_bytes=limit,
        ),
        cost_estimate=cost,
    )(inv_ttemp, teacher, center, student)

    loss = jnp.sum(partial_loss)

    # Center EMA on tiny (R, D)/(1, D) arrays.
    # TODO(synk): multi-host dist.all_reduce / world-size division not modeled.
    batch_center = jnp.sum(center_rowsum, axis=0) / jnp.float32(2 * b)        # (1, D)
    new_center = (center.astype(jnp.float32) * center_momentum
                  + batch_center * (1.0 - center_momentum))
    return loss, new_center


def dino_loss_ref(student_output, teacher_output, center, teacher_temp_epoch,
                  *, num_crops, student_temp, center_momentum):
    """Pure-JAX reference matching the PyTorch forward."""
    student_out = student_output / student_temp
    s_chunks = jnp.split(student_out, num_crops, axis=0)
    teacher_out = jax.nn.softmax((teacher_output - center) / teacher_temp_epoch, axis=-1)
    t_chunks = jnp.split(teacher_out, 2, axis=0)
    total_loss = 0.0
    n_loss_terms = 0
    for iq, q in enumerate(t_chunks):
        for v in range(num_crops):
            if v == iq:
                continue
            loss = jnp.sum(-q * jax.nn.log_softmax(s_chunks[v], axis=-1), axis=-1)
            total_loss += loss.mean()
            n_loss_terms += 1
    total_loss = total_loss / n_loss_terms
    batch_center = jnp.sum(teacher_output, axis=0, keepdims=True) / teacher_output.shape[0]
    new_center = center * center_momentum + batch_center * (1.0 - center_momentum)
    return total_loss, new_center


if __name__ == "__main__":
    # Module hyperparameters (deterministic, in-script).
    out_dim = 128
    num_crops = 4
    warmup_teacher_temp = 0.04
    teacher_temp = 0.07
    warmup_teacher_temp_epochs = 5
    num_epochs = 20
    student_temp = 0.1
    center_momentum = 0.9
    epoch = 2
    batch = 16  # per-crop batch size

    # teacher_temp_schedule exactly as in __init__
    teacher_temp_schedule = jnp.concatenate(
        (
            jnp.linspace(warmup_teacher_temp, teacher_temp, warmup_teacher_temp_epochs),
            jnp.ones(num_epochs - warmup_teacher_temp_epochs) * teacher_temp,
        ),
        axis=0,
    )
    temp_e = teacher_temp_schedule[epoch]

    # center buffer initialized to zeros as in __init__
    center = jnp.zeros((1, out_dim), jnp.float32)

    key = jax.random.PRNGKey(0)
    k1, k2 = jax.random.split(key)
    student_output = jax.random.normal(k1, (num_crops * batch, out_dim), dtype=jnp.float32)
    teacher_output = jax.random.normal(k2, (2 * batch, out_dim), dtype=jnp.float32)

    # row_block=8 -> 2 row blocks, exercising the ("parallel", "arbitrary") grid.
    loss, new_center = dino_loss_forward(
        student_output, teacher_output, center, temp_e,
        num_crops=num_crops, student_temp=student_temp,
        center_momentum=center_momentum, row_block=8,
    )
    jax.block_until_ready((loss, new_center))

    ref_loss, ref_center = dino_loss_ref(
        student_output, teacher_output, center, temp_e,
        num_crops=num_crops, student_temp=student_temp, center_momentum=center_momentum,
    )
    # bf16 teacher-prob scratch -> slightly relaxed tolerance on the loss.
    assert jnp.allclose(loss, ref_loss, rtol=5e-3, atol=5e-3), (loss, ref_loss)
    assert jnp.allclose(new_center, ref_center, rtol=1e-4, atol=1e-4)

    print("KERNEL_OK")
</pallas_src>

<mosaic_0001>
module attributes {stable_mosaic.version = 11 : i64} {
  func.func @_dino_loss_kernel(%arg0: i32, %arg1: i32, %arg2: memref<1x1xf32, #tpu.memory_space<smem>>, %arg3: memref<2x8x128xf32, #tpu.memory_space<vmem>>, %arg4: memref<1x128xf32, #tpu.memory_space<vmem>>, %arg5: memref<1x8x128xf32, #tpu.memory_space<vmem>>, %arg6: memref<1x1x1xf32, #tpu.memory_space<vmem>>, %arg7: memref<1x1x128xf32, #tpu.memory_space<vmem>>, %arg8: memref<2x8x128xbf16, #tpu.memory_space<vmem>>, %arg9: memref<1x128xf32, #tpu.memory_space<vmem>>) attributes {dimension_semantics = [#tpu.dimension_semantics<parallel>, #tpu.dimension_semantics<arbitrary>], iteration_bounds = array<i64: 2, 4>, scalar_prefetch = 0 : i64, scratch_operands = 2 : i64, tpu.core_type = #tpu.core_type<tc>, window_params = [{transform_indices = @transform_0, window_bounds = array<i64: 1, 1>}, {transform_indices = @transform_1, window_bounds = array<i64: 2, 8, 128>}, {pipeline_mode = #tpu.pipeline_mode<synchronous>, transform_indices = @transform_2, window_bounds = array<i64: 1, 128>}, {transform_indices = @transform_3, window_bounds = array<i64: 1, 8, 128>}, {transform_indices = @transform_4, window_bounds = array<i64: 1, 1, 1>}, {transform_indices = @transform_5, window_bounds = array<i64: 1, 1, 128>}]} {
    %c0 = arith.constant 0 : index
    %c0_0 = arith.constant 0 : index
    %c0_1 = arith.constant 0 : index
    %0 = vector.load %arg5[%c0, %c0_0, %c0_1] : memref<1x8x128xf32, #tpu.memory_space<vmem>>, vector<1x8x128xf32>
    %1 = vector.shape_cast %0 : vector<1x8x128xf32> to vector<8x128xf32>
    %cst = arith.constant 1.000000e+01 : f32
    %2 = vector.broadcast %cst : f32 to vector<8x128xf32>
    %3 = arith.mulf %1, %2 : vector<8x128xf32>
    %cst_2 = arith.constant dense<0xFF800000> : vector<8xf32>
    %4 = vector.multi_reduction <maximumf>, %3, %cst_2 [1] : vector<8x128xf32> to vector<8xf32>
    %5 = vector.shape_cast %4 : vector<8xf32> to vector<8x1xf32>
    %6 = vector.broadcast %5 : vector<8x1xf32> to vector<8x128xf32>
    %7 = arith.subf %3, %6 : vector<8x128xf32>
    %8 = math.exp %7 : vector<8x128xf32>
    %cst_3 = arith.constant dense<0.000000e+00> : vector<8xf32>
    %9 = vector.multi_reduction <add>, %8, %cst_3 [1] : vector<8x128xf32> to vector<8xf32>
    %10 = vector.shape_cast %9 : vector<8xf32> to vector<8x1xf32>
    %11 = math.log %10 : vector<8x1xf32>
    %12 = arith.addf %11, %5 : vector<8x1xf32>
    %13 = vector.broadcast %12 : vector<8x1xf32> to vector<8x128xf32>
    %14 = arith.subf %3, %13 : vector<8x128xf32>
    %c0_i32 = arith.constant 0 : i32
    %15 = arith.cmpi eq, %arg1, %c0_i32 : i32
    %16 = arith.extui %15 : i1 to i32
    %c0_i32_4 = arith.constant 0 : i32
    %17 = arith.cmpi ne, %16, %c0_i32_4 : i32
    scf.if %17 {
      %c0_8 = arith.constant 0 : index
      %c0_9 = arith.constant 0 : index
      %c0_10 = arith.constant 0 : index
      %27 = vector.load %arg3[%c0_8, %c0_9, %c0_10] : memref<2x8x128xf32, #tpu.memory_space<vmem>>, vector<2x8x128xf32>
      %c0_11 = arith.constant 0 : index
      %c0_12 = arith.constant 0 : index
      %28 = vector.load %arg4[%c0_11, %c0_12] : memref<1x128xf32, #tpu.memory_space<vmem>>, vector<1x128xf32>
      %29 = vector.extract_strided_slice %27 {offsets = [0, 0, 0], sizes = [1, 8, 128], strides = [1, 1, 1]} : vector<2x8x128xf32> to vector<1x8x128xf32>
      %30 = vector.shape_cast %29 : vector<1x8x128xf32> to vector<8x128xf32>
      %31 = vector.extract_strided_slice %27 {offsets = [1, 0, 0], sizes = [1, 8, 128], strides = [1, 1, 1]} : vector<2x8x128xf32> to vector<1x8x128xf32>
      %32 = vector.shape_cast %31 : vector<1x8x128xf32> to vector<8x128xf32>
      %33 = arith.addf %30, %32 : vector<8x128xf32>
      %cst_13 = arith.constant dense<0.000000e+00> : vector<128xf32>
      %34 = vector.multi_reduction <add>, %33, %cst_13 [0] : vector<8x128xf32> to vector<128xf32>
      %35 = vector.shape_cast %34 : vector<128xf32> to vector<1x128xf32>
      %c0_14 = arith.constant 0 : index
      %c0_15 = arith.constant 0 : index
      %c0_16 = arith.constant 0 : index
      %36 = vector.load %arg7[%c0_14, %c0_15, %c0_16] : memref<1x1x128xf32, #tpu.memory_space<vmem>>, vector<1x1x128xf32>
      %37 = vector.shape_cast %36 : vector<1x1x128xf32> to vector<1x128xf32>
      %38 = vector.shape_cast %35 : vector<1x128xf32> to vector<1x1x128xf32>
      tpu.vector_store %arg7[%c0_14, %c0_15, %c0_16], %38 {strides = array<i32>} : memref<1x1x128xf32, #tpu.memory_space<vmem>>, vector<1x1x128xf32>,
      %39 = vector.shape_cast %28 : vector<1x128xf32> to vector<1x1x128xf32>
      %40 = vector.broadcast %39 : vector<1x1x128xf32> to vector<2x8x128xf32>
      %41 = arith.subf %27, %40 : vector<2x8x128xf32>
      %c0_17 = arith.constant 0 : index
      %c0_18 = arith.constant 0 : index
      %42 = memref.load %arg2[%c0_17, %c0_18] : memref<1x1xf32, #tpu.memory_space<smem>>
      %43 = vector.broadcast %42 : f32 to vector<2x8x128xf32>
      %44 = arith.mulf %41, %43 : vector<2x8x128xf32>
      %cst_19 = arith.constant dense<0xFF800000> : vector<2x8xf32>
      %45 = vector.multi_reduction <maximumf>, %44, %cst_19 [2] : vector<2x8x128xf32> to vector<2x8xf32>
      %46 = vector.shape_cast %45 : vector<2x8xf32> to vector<2x8x1xf32>
      %47 = vector.broadcast %46 : vector<2x8x1xf32> to vector<2x8x128xf32>
      %48 = arith.subf %44, %47 : vector<2x8x128xf32>
      %49 = math.exp %48 : vector<2x8x128xf32>
      %cst_20 = arith.constant dense<0.000000e+00> : vector<2x8xf32>
      %50 = vector.multi_reduction <add>, %49, %cst_20 [2] : vector<2x8x128xf32> to vector<2x8xf32>
      %51 = vector.shape_cast %50 : vector<2x8xf32> to vector<2x8x1xf32>
      %52 = tpu.reciprocal %51 : vector<2x8x1xf32> -> vector<2x8x1xf32>
      %53 = vector.broadcast %52 : vector<2x8x1xf32> to vector<2x8x128xf32>
      %54 = arith.mulf %49, %53 : vector<2x8x128xf32>
      %55 = vector.extract_strided_slice %54 {offsets = [0, 0, 0], sizes = [1, 8, 128], strides = [1, 1, 1]} : vector<2x8x128xf32> to vector<1x8x128xf32>
      %56 = vector.shape_cast %55 : vector<1x8x128xf32> to vector<8x128xf32>
      %57 = arith.truncf %56 : vector<8x128xf32> to vector<8x128xbf16>
      %c0_21 = arith.constant 0 : index
      %c0_22 = arith.constant 0 : index
      %c0_23 = arith.constant 0 : index
      %58 = vector.load %arg8[%c0_21, %c0_22, %c0_23] : memref<2x8x128xbf16, #tpu.memory_space<vmem>>, vector<1x8x128xbf16>
      %59 = vector.shape_cast %58 : vector<1x8x128xbf16> to vector<8x128xbf16>
      %60 = vector.shape_cast %57 : vector<8x128xbf16> to vector<1x8x128xbf16>
      tpu.vector_store %arg8[%c0_21, %c0_22, %c0_23], %60 {strides = array<i32>} : memref<2x8x128xbf16, #tpu.memory_space<vmem>>, vector<1x8x128xbf16>,
      %61 = vector.extract_strided_slice %54 {offsets = [0, 0, 0], sizes = [1, 8, 128], strides = [1, 1, 1]} : vector<2x8x128xf32> to vector<1x8x128xf32>
      %62 = vector.shape_cast %61 : vector<1x8x128xf32> to vector<8x128xf32>
      %63 = vector.extract_strided_slice %54 {offsets = [1, 0, 0], sizes = [1, 8, 128], strides = [1, 1, 1]} : vector<2x8x128xf32> to vector<1x8x128xf32>
      %64 = vector.shape_cast %63 : vector<1x8x128xf32> to vector<8x128xf32>
      %65 = arith.addf %62, %64 : vector<8x128xf32>
      %66 = arith.truncf %65 : vector<8x128xf32> to vector<8x128xbf16>
      %c1 = arith.constant 1 : index
      %c0_24 = arith.constant 0 : index
      %c0_25 = arith.constant 0 : index
      %67 = vector.load %arg8[%c1, %c0_24, %c0_25] : memref<2x8x128xbf16, #tpu.memory_space<vmem>>, vector<1x8x128xbf16>
      %68 = vector.shape_cast %67 : vector<1x8x128xbf16> to vector<8x128xbf16>
      %69 = vector.shape_cast %66 : vector<8x128xbf16> to vector<1x8x128xbf16>
      tpu.vector_store %arg8[%c1, %c0_24, %c0_25], %69 {strides = array<i32>} : memref<2x8x128xbf16, #tpu.memory_space<vmem>>, vector<1x8x128xbf16>,
      %70 = vector.extract_strided_slice %54 {offsets = [1, 0, 0], sizes = [1, 8, 128], strides = [1, 1, 1]} : vector<2x8x128xf32> to vector<1x8x128xf32>
      %71 = vector.shape_cast %70 : vector<1x8x128xf32> to vector<8x128xf32>
      %72 = arith.mulf %71, %14 : vector<8x128xf32>
      %cst_26 = arith.constant dense<0.000000e+00> : vector<128xf32>
      %73 = vector.multi_reduction <add>, %72, %cst_26 [0] : vector<8x128xf32> to vector<128xf32>
      %74 = vector.shape_cast %73 : vector<128xf32> to vector<1x128xf32>
      %c0_27 = arith.constant 0 : index
      %c0_28 = arith.constant 0 : index
      %75 = vector.load %arg9[%c0_27, %c0_28] : memref<1x128xf32, #tpu.memory_space<vmem>>, vector<1x128xf32>
      tpu.vector_store %arg9[%c0_27, %c0_28], %74 {strides = array<i32>} : memref<1x128xf32, #tpu.memory_space<vmem>>, vector<1x128xf32>,
    } else {
    }
    %c1_i32 = arith.constant 1 : i32
    %18 = arith.cmpi eq, %arg1, %c1_i32 : i32
    %19 = arith.extui %18 : i1 to i32
    %c0_i32_5 = arith.constant 0 : i32
    %20 = arith.cmpi ne, %19, %c0_i32_5 : i32
    scf.if %20 {
      %c0_8 = arith.constant 0 : index
      %c0_9 = arith.constant 0 : index
      %c0_10 = arith.constant 0 : index
      %27 = vector.load %arg8[%c0_8, %c0_9, %c0_10] : memref<2x8x128xbf16, #tpu.memory_space<vmem>>, vector<1x8x128xbf16>
      %28 = vector.shape_cast %27 : vector<1x8x128xbf16> to vector<8x128xbf16>
      %29 = arith.extf %28 : vector<8x128xbf16> to vector<8x128xf32>
      %c0_11 = arith.constant 0 : index
      %c0_12 = arith.constant 0 : index
      %30 = vector.load %arg9[%c0_11, %c0_12] : memref<1x128xf32, #tpu.memory_space<vmem>>, vector<1x128xf32>
      %31 = arith.mulf %29, %14 : vector<8x128xf32>
      %cst_13 = arith.constant dense<0.000000e+00> : vector<128xf32>
      %32 = vector.multi_reduction <add>, %31, %cst_13 [0] : vector<8x128xf32> to vector<128xf32>
      %33 = vector.shape_cast %32 : vector<128xf32> to vector<1x128xf32>
      %34 = arith.addf %30, %33 : vector<1x128xf32>
      %c0_14 = arith.constant 0 : index
      %c0_15 = arith.constant 0 : index
      %35 = vector.load %arg9[%c0_14, %c0_15] : memref<1x128xf32, #tpu.memory_space<vmem>>, vector<1x128xf32>
      tpu.vector_store %arg9[%c0_14, %c0_15], %34 {strides = array<i32>} : memref<1x128xf32, #tpu.memory_space<vmem>>, vector<1x128xf32>,
    } else {
    }
    %c2_i32 = arith.constant 2 : i32
    %21 = arith.cmpi sge, %arg1, %c2_i32 : i32
    %22 = arith.extui %21 : i1 to i32
    %c0_i32_6 = arith.constant 0 : i32
    %23 = arith.cmpi ne, %22, %c0_i32_6 : i32
    scf.if %23 {
      %c1 = arith.constant 1 : index
      %c0_8 = arith.constant 0 : index
      %c0_9 = arith.constant 0 : index
      %27 = vector.load %arg8[%c1, %c0_8, %c0_9] : memref<2x8x128xbf16, #tpu.memory_space<vmem>>, vector<1x8x128xbf16>
      %28 = vector.shape_cast %27 : vector<1x8x128xbf16> to vector<8x128xbf16>
      %29 = arith.extf %28 : vector<8x128xbf16> to vector<8x128xf32>
      %c0_10 = arith.constant 0 : index
      %c0_11 = arith.constant 0 : index
      %30 = vector.load %arg9[%c0_10, %c0_11] : memref<1x128xf32, #tpu.memory_space<vmem>>, vector<1x128xf32>
      %31 = arith.mulf %29, %14 : vector<8x128xf32>
      %cst_12 = arith.constant dense<0.000000e+00> : vector<128xf32>
      %32 = vector.multi_reduction <add>, %31, %cst_12 [0] : vector<8x128xf32> to vector<128xf32>
      %33 = vector.shape_cast %32 : vector<128xf32> to vector<1x128xf32>
      %34 = arith.addf %30, %33 : vector<1x128xf32>
      %c0_13 = arith.constant 0 : index
      %c0_14 = arith.constant 0 : index
      %35 = vector.load %arg9[%c0_13, %c0_14] : memref<1x128xf32, #tpu.memory_space<vmem>>, vector<1x128xf32>
      tpu.vector_store %arg9[%c0_13, %c0_14], %34 {strides = array<i32>} : memref<1x128xf32, #tpu.memory_space<vmem>>, vector<1x128xf32>,
    } else {
    }
    %c3_i32 = arith.constant 3 : i32
    %24 = arith.cmpi eq, %arg1, %c3_i32 : i32
    %25 = arith.extui %24 : i1 to i32
    %c0_i32_7 = arith.constant 0 : i32
    %26 = arith.cmpi ne, %25, %c0_i32_7 : i32
    scf.if %26 {
      %c0_8 = arith.constant 0 : index
      %c0_9 = arith.constant 0 : index
      %27 = vector.load %arg9[%c0_8, %c0_9] : memref<1x128xf32, #tpu.memory_space<vmem>>, vector<1x128xf32>
      %cst_10 = arith.constant dense<0.000000e+00> : vector<1xf32>
      %28 = vector.multi_reduction <add>, %27, %cst_10 [1] : vector<1x128xf32> to vector<1xf32>
      %29 = vector.shape_cast %28 : vector<1xf32> to vector<1x1xf32>
      %cst_11 = arith.constant -0.010416667 : f32
      %30 = vector.broadcast %cst_11 : f32 to vector<1x1xf32>
      %31 = arith.mulf %29, %30 : vector<1x1xf32>
      %32 = vector.shape_cast %31 : vector<1x1xf32> to vector<1x1x1xf32>
      %c0_12 = arith.constant 0 : index
      %c0_13 = arith.constant 0 : index
      %c0_14 = arith.constant 0 : index
      %33 = vector.load %arg6[%c0_12, %c0_13, %c0_14] : memref<1x1x1xf32, #tpu.memory_space<vmem>>, vector<1x1x1xf32>
      tpu.vector_store %arg6[%c0_12, %c0_13, %c0_14], %32 {strides = array<i32>} : memref<1x1x1xf32, #tpu.memory_space<vmem>>, vector<1x1x1xf32>,
    } else {
    }
    return
  }
  func.func @transform_0(%arg0: i32, %arg1: i32) -> (i32, i32) {
    %c0_i32 = arith.constant 0 : i32
    %c0_i32_0 = arith.constant 0 : i32
    %c0_i32_1 = arith.constant 0 : i32
    return %c0_i32, %c0_i32_0 : i32, i32
  }
  func.func @transform_1(%arg0: i32, %arg1: i32) -> (i32, i32, i32) {
    %c0_i32 = arith.constant 0 : i32
    %c0_i32_0 = arith.constant 0 : i32
    %c0_i32_1 = arith.constant 0 : i32
    return %c0_i32, %arg0, %c0_i32_0 : i32, i32, i32
  }
  func.func @transform_2(%arg0: i32, %arg1: i32) -> (i32, i32) {
    %c0_i32 = arith.constant 0 : i32
    %c0_i32_0 = arith.constant 0 : i32
    %c0_i32_1 = arith.constant 0 : i32
    return %c0_i32, %c0_i32_0 : i32, i32
  }
  func.func @transform_3(%arg0: i32, %arg1: i32) -> (i32, i32, i32) {
    %c0_i32 = arith.constant 0 : i32
    %c0_i32_0 = arith.constant 0 : i32
    return %arg1, %arg0, %c0_i32 : i32, i32, i32
  }
  func.func @transform_4(%arg0: i32, %arg1: i32) -> (i32, i32, i32) {
    %c0_i32 = arith.constant 0 : i32
    %c0_i32_0 = arith.constant 0 : i32
    %c0_i32_1 = arith.constant 0 : i32
    return %arg0, %c0_i32, %c0_i32_0 : i32, i32, i32
  }
  func.func @transform_5(%arg0: i32, %arg1: i32) -> (i32, i32, i32) {
    %c0_i32 = arith.constant 0 : i32
    %c0_i32_0 = arith.constant 0 : i32
    %c0_i32_1 = arith.constant 0 : i32
    return %arg0, %c0_i32, %c0_i32_0 : i32, i32, i32
  }
}

</mosaic_0001>

<bundles_post_ra>
// kernel: tpu_custom_call.1
= control target key start
LH: loop header
LB: loop body
LE: loop exit
PB: predicated region body
PF: predicated region fallthrough
CT: control target
= control target key end

     0   :  { %s1440_s0 = inlined_call_operand.<no memory space> [shape: f32[1,1], index: 0, kind: input, shape index: {}]   ;;  %s1441_s1 = inlined_call_operand.hbm [shape: f32[2,16,128], index: 1, kind: input, shape index: {}]   ;;  %s1442_s2 = inlined_call_operand.hbm [shape: f32[1,128], index: 2, kind: input, shape index: {}]   ;;  %s1443_s3 = inlined_call_operand.hbm [shape: f32[4,16,128], index: 3, kind: input, shape index: {}]   ;;  %s1444_s4 = inlined_call_operand.hbm [shape: f32[2,1,1], index: 4, kind: output, shape index: {0}]   ;;  %s1445_s5 = inlined_call_operand.hbm [shape: f32[2,1,128], index: 5, kind: output, shape index: {1}]  }
   0x1   :  { %1460 = sst [smem:[#allocation23_spill]] %s1441_s1 }
   0x2   :  { %1461 = sst [smem:[#allocation24_spill]] %s1442_s2 }
   0x3   :  { %1462 = sst [smem:[#allocation25_spill]] %s1444_s4 }
   0x4   :  { %1463 = sst [smem:[#allocation26_spill]] %s1445_s5 }
   0x5   :  { %11 = sst [smem:[#allocation4]] %s1440_s0 }
   0x6   :  { %12 = vsyncpa [#allocation6], 0 }
   0x7   :  { %14 = vsyncpa [#allocation6 + $0x1], 0 }
   0x8   :  { %15 = vsyncpa [#allocation9], 0 }
   0x9   :  { %16 = vsyncpa [#allocation7], 0 }
   0xa   :  { %18 = vsyncpa [#allocation7 + $0x1], 0 }
   0xb   :  { %19 = vsyncpa [#allocation13], 0 }
   0xc   :  { %21 = vsyncpa [#allocation13 + $0x1], 0  ;;  %s1058_s20 = smov 0   ;;  %s1060_s21 = smov 0  }
   0xd   :  { %s1062_s22 = smov 0   ;;  %s1064_s23 = smov 0  }
   0xe   :  { %s1066_s24 = smov 0   ;;  %s1068_s25 = smov 0  }
   0xf   :  { %s1070_s0 = smov 0   ;;  %s1072_s26 = smov 0  }
  0x10   :  { %s1074_s27 = smov 0   ;;  %s1076_s28 = smov 0  }
  0x11   :  { %s1078_s29 = smov 0  }
  0x12 LB: > { %1464 = sst [smem:[#allocation19_spill]] %s987_s23  ;;  %p74_p0 = scmp.ne.s32.totalorder %s995_s25, %s991_s24  ;;  %s1015_s29 = sphi %s1078_s29, %s27_s29   ;;  %s1011_s28 = sphi %s1076_s28, %s1506_s28   ;;  %s1007_s27 = sphi %s1074_s27, %s1498_s27   ;;  %s1003_s26 = sphi %s1072_s26, %s1505_s26   ;;  %s999_s0 = sphi %s1070_s0, %s1497_s0   ;;  %s995_s25 = sphi %s1068_s25, %s1504_s25   ;;  %s991_s24 = sphi %s1066_s24, %s1503_s24   ;;  %s987_s23 = sphi %s1064_s23, %s1502_s23   ;;  %s983_s22 = sphi %s1062_s22, %s1501_s22   ;;  %s979_s21 = sphi %s1060_s21, %s1500_s21   ;;  %s975_s20 = sphi %s1058_s20, %s1499_s20  }
  0x13   : > { %1465 = sst [smem:[#allocation20_spill]] %s1007_s27  ;;  %p1447_p1 = scmp.eq.s32.totalorder %s1015_s29, 0 }
  0x14   : > { %p1446_p2 = scmp.lt.s32.totalorder %s1015_s29, 8  ;;  %s219_s6 = sand.u32 1, %s1015_s29  }
  0x15   : > { %p76_p3 = por %p1447_p1, %p74_p0  ;;  %s221_s7 = sand.u32 1, %s995_s25  }
  0x16   : > { %s605_s8 = sshll.u32 %s1011_s28, 7  ;;  %s604_s9 = sshll.u32 %s221_s7, 4 }
  0x17   : > { %s1466_s1 = sld [smem:[#allocation23_spill]]  ;;  %p1133_p4 = pnand %p1446_p2, %p76_p3 }
  0x18   : > { %s223_s14 = scalar_lea.vmem [#allocation5], %s604_s9  ;;  %s1139_s16 = scalar_lea.sflag [#allocation6], %s219_s6 }
  0x19   : > { %s229_s15 = sshll.u32 %s223_s14, 4  ;;  %p767_p6 = pneg %p1133_p4  ;;  %s1137_s15 = int_to_ptr.vmem [resolvable:$true] %s229_s15 }
  0x1d   : > { %s1129_s12 = scalar_lea.hbm %s1466_s1, %s605_s8  ;;  %s770_s7 = scalar_lea.hbm %s1466_s1, 512 }
  0x1e   : > { %s765_s17 = scalar_lea.hbm %s1129_s12, 256  ;;  %p771_p9 = scmp.lt.u32.totalorder %s1129_s12, %s1466_s1 }
  0x1f   : > { %p766_p5 = scmp.ne.s32.totalorder %s1129_s12, %s765_s17  ;;  %p772_p10 = scmp.lt.u32.totalorder %s770_s7, %s765_s17 }
  0x20   : > { %p774_p12 = scmp.lt.u32.totalorder %s765_s17, %s1129_s12 }
  0x21   : > { %p768_p7 = pnand %p767_p6, %p766_p5  ;;  %p773_p11 = por %p772_p10, %p771_p9 }
  0x23   : > { %p769_p8 = pneg %p768_p7  ;;  %p775_p13 = por %p774_p12, %p773_p11 }
  0x25   : > { %p776_p3 = pnand %p775_p13, %p769_p8 }
  0x27   : > { %779 = shalt.err (!%p776_p3)
}
  0x28   : > { %s780_s6 = scalar_lea.vmem %s1137_s15, 256  ;;  %s1017_s9 = smov [#allocation5]  }
  0x29   : > { %p781_p5 = scmp.ne.s32.totalorder %s1137_s15, %s780_s6  ;;  %s785_s11 = sshll.u32 %s1017_s9, 4  ;;  %s786_s11 = int_to_ptr.vmem [resolvable:$false] %s785_s11 }
  0x2a   : > { %s787_s14 = scalar_lea.vmem %s786_s11, 512  ;;  %p788_p1 = scmp.lt.s32.totalorder %s1137_s15, %s786_s11 }
  0x2b   : > { %p783_p7 = pnand %p781_p5, %p767_p6  ;;  %p789_p9 = scmp.lt.s32.totalorder %s787_s14, %s780_s6 }
  0x2d   : > { %p784_p2 = pneg %p783_p7  ;;  %p790_p10 = por %p789_p9, %p788_p1 }
  0x2f   : > { %p791_p11 = pnand %p790_p10, %p784_p2 }
  0x31   : > { %794 = shalt.err (!%p791_p11)
}
  0x32   : > { %s1018_s17 = smov 256   ;;  %s1019_s18 = smov 128  }
  0x33   : > { %s1020_s19 = smov 8   ;;  %s1168_s7 = sadd.s32 4294967295, %s1015_s29  }
  0x34   : > { %646 = dma.hbm_to_vmem [thread:$0]  (!%p1133_p4), %s1129_s12, 256, %s1137_s15, %s1139_s16, %s1018_s17, %s1019_s18, %s1020_s19  }
  0x35   : > { %s600_s8 = sadd.s32 4294967294, %s1015_s29   ;;  %p80_p1 = scmp.ne.s32.totalorder %s991_s24, %s987_s23 }
  0x36   : > { %p1451_p2 = scmp.eq.s32.totalorder %s1168_s7, 0  ;;  %p129_p6 = scmp.ne.s32.totalorder %s979_s21, %s975_s20 }
  0x37   : > { %p153_p8 = scmp.eq.s32.totalorder %s1168_s7, 7  ;;  %p159_p4 = scmp.eq.s32.totalorder %s600_s8, 7 }
  0x38   : > { %p1179_p12 = por %p1451_p2, %p80_p1  ;;  %p1185_p13 = por %p129_p6, %p1451_p2 }
  0x39   : > { %p1192_p3 = por %p153_p8, %p74_p0  ;;  %p1196_p5 = por %p159_p4, %p80_p1 }
  0x3a   : > { %s1468_s10 = scalar_select %p1179_p12, 1, 0 }
  0x3b   : > { %s1469_s12 = scalar_select %p1185_p13, 1, 0 }
  0x3c   : > { %s1470_s13 = scalar_select %p1192_p3, 1, 0 }
  0x3d   : > { %s1471_s20 = scalar_select %p1196_p5, 1, 0 }
  0x3e   : > { %p601_p7 = scmp.ge.s32.totalorder %s1015_s29, 1  ;;  %p192_p9 = scmp.lt.s32.totalorder %s1015_s29, 9 }
  0x3f   : > { %1472 = sst [smem:[#allocation21_spill]] %s1471_s20  ;;  %s1021_s6 = smov [#allocation8]  }
  0x40   : > { %p1202_p10 = pnand %p601_p7, %p192_p9  ;;  %s208_s9 = sshll.u32 %s1021_s6, 4  ;;  %s209_s9 = int_to_ptr.vmem [resolvable:$true] %s208_s9 }
  0x41   : > { %s36_s11 = sadd.s32 1, %s1007_s27  ;;  %s39_s18 = sadd.s32 1, %s1011_s28 }
  0x42   : > { %s1473_s15 = scalar_select %p1202_p10, 1, 0 }
  0x43   : > { %p639_p11 = pneg %p1202_p10  ;;  %p1215_p1 = scmp.ge.s32.totalorder %s36_s11, 4 }
  0x44   : > { %s1476_s2 = sld [smem:[#allocation24_spill]] }
  0x45   : > { %p1211_p0 = pnand %p639_p11, %p1451_p2 }
  0x46   : > { %s1475_s17 = scalar_select %p1215_p1, 1, 0 }
  0x47   : > { %p797_p4 = pneg %p1211_p0 }
  0x4a   : > { %s795_s6 = scalar_lea.hbm %s1476_s2, 16 }
  0x4b   : > { %p796_p8 = scmp.ne.s32.totalorder %s1476_s2, %s795_s6  ;;  %p802_p11 = scmp.lt.u32.totalorder %s795_s6, %s1476_s2 }
  0x4d   : > { %p798_p7 = pnand %p797_p4, %p796_p8 }
  0x4f   : > { %p799_p9 = pneg %p798_p7 }
  0x51   : > { %p804_p2 = pnand %p802_p11, %p799_p9 }
  0x53   : > { %807 = shalt.err (!%p804_p2)
}
  0x54   : > { %s808_s19 = scalar_lea.vmem %s209_s9, 16  ;;  %s815_s30 = scalar_lea.vmem %s209_s9, 32 }
  0x55   : > { %p809_p6 = scmp.ne.s32.totalorder %s209_s9, %s808_s19  ;;  %p816_p13 = scmp.lt.s32.totalorder %s209_s9, %s209_s9 }
  0x56   : > { %p817_p12 = scmp.lt.s32.totalorder %s815_s30, %s808_s19 }
  0x57   : > { %p811_p5 = pnand %p809_p6, %p797_p4 }
  0x58   : > { %p818_p10 = por %p817_p12, %p816_p13 }
  0x59   : > { %p812_p3 = pneg %p811_p5 }
  0x5b   : > { %p819_p1 = pnand %p818_p10, %p812_p3 }
  0x5d   : > { %822 = shalt.err (!%p819_p1)
}
  0x5e   : > { %642 = dma.hbm_to_vmem [thread:$0]  (!%p1211_p0), %s1476_s2, 16, %s209_s9, [#allocation9]  }
  0x5f   : > { %p1477_p2 = scmp.ne.s32.totalorder %s1475_s17, 0  ;;  %p1479_p12 = scmp.eq.s32.totalorder %s1015_s29, 0 }
  0x60   : > { %p1480_p13 = scmp.ne.s32.totalorder %s983_s22, %s979_s21  ;;  %s241_s9 = sand.u32 1, %s983_s22  }
  0x61   : > { %s1508_s11 = smov (%p1477_p2, %s36_s11), 0  ;;  %s1510_s18 = smov (!%p1477_p2, %s39_s18), %s1011_s28 }
  0x62   : > { %1478 = sst [smem:[#allocation22_spill]] %s1508_s11  ;;  %s111_s5 = ssub.s32 %s1007_s27, %s1508_s11 }
  0x63   : > { %p1253_p3 = por %p1480_p13, %p1479_p12  ;;  %p41_p5 = scmp.ge.s32.totalorder %s1510_s18, 2 }
  0x64   : > { %s606_s14 = sshll.u32 %s241_s9, 3  ;;  %s607_s19 = sshll.u32 %s1007_s27, 1 }
  0x65   : > { %s1512_s18 = smov (%p41_p5, %s1510_s18), 0  ;;  %s248_s17 = sadd.s32 %s1011_s28, %s607_s19 }
  0x66   : > { %s64_s8 = ssub.s32 %s1011_s28, %s1512_s18  ;;  %s608_s6 = sshll.u32 %s248_s17, 7 }
  0x67   : > { %p65_p10 = scmp.eq.s32.totalorder %s64_s8, 0  ;;  %s113_s30 = sor.u32 %s111_s5, %s64_s8 }
  0x68   : > { %p114_p0 = scmp.eq.s32.totalorder %s113_s30, 0  ;;  %s1267_s2 = scalar_lea.hbm %s1443_s3, %s608_s6 }
  0x69   : > { %s1482_s11 = sadd.s32 1, %s995_s25  ;;  %s1483_s27 = sadd.s32 1, %s983_s22 }
  0x6a   : > { %s1272_s9 = scalar_select %p65_p10, %s995_s25, %s1482_s11  }
  0x6b   : > { %s1277_s4 = scalar_select %p114_p0, %s983_s22, %s1483_s27  }
  0x6c   : > { %s243_s19 = scalar_lea.vmem [#allocation10], %s606_s14  ;;  %p1484_p1 = scmp.lt.s32.totalorder %s1015_s29, 8 }
  0x6d   : > { %s252_s17 = sshll.u32 %s243_s19, 4  ;;  %s823_s8 = scalar_lea.hbm %s1267_s2, 128  ;;  %s253_s17 = int_to_ptr.vmem [resolvable:$true] %s252_s17 }
  0x6e   : > { %p1283_p6 = pnand %p1484_p1, %p1253_p3  ;;  %p824_p8 = scmp.ne.s32.totalorder %s1267_s2, %s823_s8 }
  0x6f   : > { %s828_s23 = scalar_lea.hbm %s1443_s3, 1024  ;;  %p829_p11 = scmp.lt.u32.totalorder %s1267_s2, %s1443_s3 }
  0x70   : > { %p825_p4 = pneg %p1283_p6  ;;  %p830_p2 = scmp.lt.u32.totalorder %s828_s23, %s823_s8 }
  0x71   : > { %p832_p13 = scmp.lt.u32.totalorder %s823_s8, %s1267_s2 }
  0x72   : > { %p826_p7 = pnand %p825_p4, %p824_p8  ;;  %p831_p12 = por %p830_p2, %p829_p11 }
  0x74   : > { %p827_p9 = pneg %p826_p7  ;;  %p833_p3 = por %p832_p13, %p831_p12 }
  0x76   : > { %p834_p5 = pnand %p833_p3, %p827_p9 }
  0x78   : > { %837 = shalt.err (!%p834_p5)
}
  0x79   : > { %s838_s30 = scalar_lea.vmem %s253_s17, 128  ;;  %s1022_s1 = smov [#allocation10]  }
  0x7a   : > { %p839_p10 = scmp.ne.s32.totalorder %s253_s17, %s838_s30  ;;  %s843_s20 = sshll.u32 %s1022_s1, 4  ;;  %s844_s20 = int_to_ptr.vmem [resolvable:$false] %s843_s20 }
  0x7b   : > { %s845_s19 = scalar_lea.vmem %s844_s20, 256  ;;  %p846_p8 = scmp.lt.s32.totalorder %s253_s17, %s844_s20 }
  0x7c   : > { %p841_p0 = pnand %p839_p10, %p825_p4  ;;  %p847_p7 = scmp.lt.s32.totalorder %s845_s19, %s838_s30 }
  0x7e   : > { %p842_p1 = pneg %p841_p0  ;;  %p848_p2 = por %p847_p7, %p846_p8 }
  0x80   : > { %p849_p11 = pnand %p848_p2, %p842_p1 }
  0x82   : > { %852 = shalt.err (!%p849_p11)
}
  0x83   : > { %649 = dma.hbm_to_vmem [thread:$0]  (!%p1283_p6), %s1267_s2, 128, %s253_s17, %s1139_s16  }
  0x84   : > { %p1486_p9 = scmp.ne.s32.totalorder %s1473_s15, 0 }
  0x85   : > { %s263_s8 = sand.u32 (!%p1486_p9), 1, %s1168_s7   ;;  %s1313_s27 = sand.u32 (!%p1486_p9), 1, %s991_s24  }
  0x86   : > { %261 = sbr.rel (%p1486_p9) target bundleno = 885 (0x375), region = 36  ;;  %s610_s11 = sshll.u32 (!%p1486_p9), %s1313_s27, 4 }
  0x87   : > { %s264_s23 = scalar_lea.sflag (!%p1486_p9), [#allocation6], %s263_s8  ;;  %s1316_s14 = scalar_lea.vmem (!%p1486_p9), [#allocation5], %s610_s11 }
  0x88   : > { %p1487_p4 = scmp.ne.s32.totalorder (!%p1486_p9), %s1468_s10, 0 }
  0x8d   : > { %954 = dma.done.wait (%p1487_p4), %s264_s23, 256  }
  0x8e   : > { %956 = vsyncadd (%p1487_p4), %s264_s23, 4294967040  ;;  %p1488_p6 = scmp.eq.s32.totalorder %s1168_s7, 0 }
  0x90   : > { %958 = dma.done.wait (%p1488_p6), [#allocation9], 16   ;;  %p1489_p12 = pmov %p1488_p6 }
  0x91   : > { %s278_s2 = sand.u32 1, %s979_s21   ;;  %p1490_p13 = scmp.ne.s32.totalorder %s1469_s12, 0 }
  0x92   : > { %960 = vsyncadd (%p1489_p12), [#allocation9], 4294967280  ;;  %s612_s16 = sshll.u32 %s278_s2, 3 }
  0x93   : > { %s280_s15 = scalar_lea.vmem [#allocation10], %s612_s16 }
  0x94   : > { %962 = dma.done.wait (%p1490_p13), %s264_s23, 128  }
  0x95   : > { %964 = vsyncadd (%p1490_p13), %s264_s23, 4294967168  ;;  %v315_v0 = vld [vmem:[%s280_s15] sm:$0xff]  ;;  %s308_s7 = scalar_lea.vmem [#allocation11], %s1313_s27  ;;  %s314_s10 = scalar_lea.vmem [#allocation12], %s1313_s27 }
  0x96   : > { %v316_v1 = vmul.f32 10.0, %v315_v0  ;;  %p613_p3 = scmp.ne.s32.totalorder %s999_s0, 0 }
  0x97   : > { %v333_v11 = vld [vmem:[%s1316_s14 + $0x8] sm:$0xff] (!%p613_p3)  ;;  %v614_v12 = vld [vmem:[#allocation8] ss:$0 sm:$0xff] (!%p613_p3)  ;;  %s351_s12 = sld [smem:[#allocation4]] (!%p613_p3) }
  0x98   : > { %317 = vmax.xlane.f32.xlu0 %v316_v1  ;;  %v332_v13 = vld [vmem:[%s1316_s14] sm:$0xff] (!%p613_p3)  ;;  %v350_v15 = vsub.f32 (!%p613_p3), %v333_v11, %v614_v12 }
  0x99   : > { %v335_v14 = vadd.f32 (!%p613_p3), %v333_v11, %v332_v13  ;;  %v349_v17 = vsub.f32 (!%p613_p3), %v332_v13, %v614_v12 }
  0x9b   : > { %v336_v16 = vrot.slane (!%p613_p3), %v335_v14, 4 }
  0x9d   : > { %v337_v18 = vadd.f32 (!%p613_p3), %v336_v16, %v335_v14  ;;  %v352_v19 = vstv (!%p613_p3), %s351_s12 }
  0x9e   : > { %v354_v20 = vmul.f32 (!%p613_p3), %v352_v19, %v350_v15  ;;  %v353_v22 = vmul.f32 (!%p613_p3), %v352_v19, %v349_v17 }
  0x9f   : > { %v338_v21 = vrot.slane (!%p613_p3), %v337_v18, 2 }
  0xa1   : > { %v339_v23 = vadd.f32 (!%p613_p3), %v338_v21, %v337_v18 }
  0xa3   : > { %v340_v24 = vrot.slane (!%p613_p3), %v339_v23, 1 }
  0xa5   : > { %v341_v25 = vadd.f32 (!%p613_p3), %v340_v24, %v339_v23 }
  0xa7   : > { %342 = vst [vmem:[%s314_s10] sm:$0x1] (!%p613_p3), %v341_v25 }
 0x125   : > { %v318_v2 = vpop.xlane.xlu0 %317 }
 0x126   : > { %v319_v3 = vsub.f32 %v316_v1, %v318_v2 }
 0x128   : > { %v320_v4 = vmul.f32 1.442695, %v319_v3 }
 0x12a   : > { %753 = vpow2.f32 %v320_v4 }
 0x134   : > { %v754_v5 = vpop.eup %753 }
 0x135   : > { %322 = vadd.xlane.f32.xlu0 %v754_v5 }
 0x139   : > { %357 = vmax.xlane.f32.xlu0 (!%p613_p3), %v354_v20 }
 0x13d   : > { %355 = vmax.xlane.f32.xlu0 (!%p613_p3), %v353_v22 }
 0x1c2   : > { %v323_v6 = vpop.xlane.xlu0 %322 }
 0x1c3   : > { %755 = vlog2.f32 %v323_v6 }
 0x1c6   : > { %v358_v26 = vpop.xlane.xlu0 (!%p613_p3), %357 }
 0x1c7   : > { %v360_v27 = vsub.f32 (!%p613_p3), %v354_v20, %v358_v26 }
 0x1c9   : > { %v363_v28 = vmul.f32 (!%p613_p3), 1.442695, %v360_v27 }
 0x1ca   : > { %v356_v29 = vpop.xlane.xlu0 (!%p613_p3), %355 }
 0x1cb   : > { %757 = vpow2.f32 (!%p613_p3), %v363_v28  ;;  %v359_v30 = vsub.f32 (!%p613_p3), %v353_v22, %v356_v29 }
 0x1cc   : > { %331 = sbr.rel (%p613_p3) target bundleno = 640 (0x280), region = 52 }
 0x1cd   : > { %v756_v7 = vpop.eup %755  ;;  %v361_v31 = vmul.f32 (!%p613_p3), 1.442695, %v359_v30 }
 0x1ce   : > { %v325_v8 = vmul.f32 0.6931472, %v756_v7 }
 0x1cf   : > { %759 = vpow2.f32 (!%p613_p3), %v361_v31 }
 0x1d0   : > { %v326_v9 = vadd.f32 %v325_v8, %v318_v2 }
 0x1d2   : > { %v1331_v10 = vsub.f32 %v316_v1, %v326_v9 }
 0x1d5   : > { %v758_v32 = vpop.eup %757 }
 0x1d6   : > { %367 = vadd.xlane.f32.xlu1 %v758_v32 }
 0x1d9   : > { %v760_v33 = vpop.eup %759 }
 0x1da   : > { %365 = vadd.xlane.f32.xlu1 %v760_v33 }
 0x263   : > { %v368_v34 = vpop.xlane.xlu1 %367 }
 0x264   : > { %761 = vrcp.f32 %v368_v34 }
 0x267   : > { %v366_v35 = vpop.xlane.xlu1 %365 }
 0x268   : > { %763 = vrcp.f32 %v366_v35 }
 0x26e   : > { %v762_v36 = vpop.eup %761 }
 0x26f   : > { %v372_v37 = vmul.f32 %v762_v36, %v758_v32 }
 0x271   : > { %v379_v38 = vmul.f32 %v372_v37, %v1331_v10 }
 0x272   : > { %v764_v39 = vpop.eup %763 }
 0x273   : > { %v380_v40 = vrot.slane %v379_v38, 4  ;;  %v371_v41 = vmul.f32 %v764_v39, %v760_v33 }
 0x275   : > { %v381_v42 = vadd.f32 %v380_v40, %v379_v38  ;;  %v375_v43 = vadd.f32 %v372_v37, %v371_v41 }
 0x277   : > { %v382_v44 = vrot.slane %v381_v42, 2  ;;  %v625_v45 = vpack.c.bf16 %v375_v43, %v371_v41 }
 0x279   : > { %v383_v46 = vadd.f32 %v382_v44, %v381_v42  ;;  %626 = vst [vmem:[#allocation2] sm:$0xff] %v625_v45  }
 0x27b   : > { %v384_v47 = vrot.slane %v383_v46, 1 }
 0x27d   : > { %v385_v48 = vadd.f32 %v384_v47, %v383_v46 }
 0x27f   : > { %386 = vst [vmem:[#allocation3] sm:$0x1] %v385_v48 }
 0x280 PF: > { %p615_p5 = scmp.ne.s32.totalorder %s999_s0, 1 }
 0x281   : > { %v391_v49 = vld [vmem:[#allocation2] sm:$0xf] (!%p615_p5) }
 0x282   : > { %390 = sbr.rel (%p615_p5) target bundleno = 661 (0x295), region = 56  ;;  %v392_v50 = vunpack.c.l.bf16 (!%p615_p5), %v391_v49 }
 0x284   : > { %v394_v51 = vmul.f32 (!%p615_p5), %v392_v50, %v1331_v10 }
 0x286   : > { %v395_v52 = vrot.slane (!%p615_p5), %v394_v51, 4  ;;  %v393_v57 = vld [vmem:[#allocation3] sm:$0x1] (!%p615_p5) }
 0x288   : > { %v396_v53 = vadd.f32 (!%p615_p5), %v395_v52, %v394_v51 }
 0x28a   : > { %v397_v54 = vrot.slane %v396_v53, 2 }
 0x28c   : > { %v398_v55 = vadd.f32 %v397_v54, %v396_v53 }
 0x28e   : > { %v399_v56 = vrot.slane %v398_v55, 1 }
 0x290   : > { %v400_v58 = vadd.f32 %v399_v56, %v398_v55 }
 0x292   : > { %v401_v59 = vadd.f32 %v400_v58, %v393_v57 }
 0x294   : > { %402 = vst [vmem:[#allocation3] sm:$0x1] %v401_v59 }
 0x295 PF: > { %p616_p10 = scmp.lt.s32.totalorder %s999_s0, 2 }
 0x296   : > { %v408_v60 = vld [vmem:[#allocation2 + $0x4] sm:$0xf] (!%p616_p10) }
 0x297   : > { %406 = sbr.rel (%p616_p10) target bundleno = 682 (0x2aa), region = 60  ;;  %v409_v61 = vunpack.c.l.bf16 (!%p616_p10), %v408_v60 }
 0x299   : > { %v411_v62 = vmul.f32 (!%p616_p10), %v409_v61, %v1331_v10 }
 0x29b   : > { %v412_v63 = vrot.slane (!%p616_p10), %v411_v62, 4  ;;  %v410_v4 = vld [vmem:[#allocation3] sm:$0x1] (!%p616_p10) }
 0x29d   : > { %v413_v0 = vadd.f32 (!%p616_p10), %v412_v63, %v411_v62 }
 0x29f   : > { %v414_v1 = vrot.slane %v413_v0, 2 }
 0x2a1   : > { %v415_v2 = vadd.f32 %v414_v1, %v413_v0 }
 0x2a3   : > { %v416_v3 = vrot.slane %v415_v2, 1 }
 0x2a5   : > { %v417_v5 = vadd.f32 %v416_v3, %v415_v2 }
 0x2a7   : > { %v418_v6 = vadd.f32 %v417_v5, %v410_v4 }
 0x2a9   : > { %419 = vst [vmem:[#allocation3] sm:$0x1] %v418_v6 }
 0x2aa PF: > { %p617_p0 = scmp.ne.s32.totalorder %s999_s0, 3 }
 0x2ab   : > { %vm425_vm0 = vcmask (!%p617_p0), 1040384   ;;  %vm430_vm1 = vcmask (!%p617_p0), 0  }
 0x2ac   : > { %423 = sbr.rel (%p617_p0) target bundleno = 835 (0x343), region = 64 }
 0x2b0   : > { %v424_v7 = vld [vmem:[#allocation3] sm:$0x1] (!%p617_p0) }
 0x2b1   : > { %v426_v8 = vsel (!%p617_p0), %vm425_vm0, %v424_v7, 0.0 }
 0x2b2   : > { %427 = vadd.xlane.f32.xlu0 (!%p617_p0), %v426_v8 }
 0x33f   : > { %v428_v9 = vpop.xlane.xlu0 %427 }
 0x340   : > { %v429_v10 = vmul.f32 -0.010416667, %v428_v9 }
 0x342   : > { %431 = vst.msk [vmem:[%s308_s7] sm:$0x1] %vm430_vm1, %v429_v10 }
 0x343 PF: > { %s618_s17 = sshll.u32 %s1003_s26, 4  ;;  %s1491_s6 = sld [smem:[#allocation25_spill]] }
 0x344   : > { %s449_s1 = sshll.u32 %s308_s7, 4  ;;  %s433_s20 = scalar_lea.sflag [#allocation7], %s1313_s27  ;;  %s450_s1 = int_to_ptr.vmem [resolvable:$true] %s449_s1 }
 0x345   : > { %s853_s19 = scalar_lea.vmem %s450_s1, 16  ;;  %p1492_p8 = scmp.ne.s32.totalorder %s1470_s13, 0 }
 0x346   : > { %p854_p1 = scmp.ne.s32.totalorder %s450_s1, %s853_s19  ;;  %s1023_s8 = smov [#allocation11]  }
 0x347   : > { %s857_s11 = sshll.u32 %s1023_s8, 4  ;;  %s858_s11 = int_to_ptr.vmem [resolvable:$false] %s857_s11 }
 0x348   : > { %p855_p7 = pnand %p854_p1, %p1492_p8  ;;  %s859_s23 = scalar_lea.vmem %s858_s11, 32 }
 0x349   : > { %s1354_s30 = scalar_lea.hbm %s1491_s6, %s618_s17  ;;  %p860_p11 = scmp.lt.s32.totalorder %s450_s1, %s858_s11 }
 0x34a   : > { %p856_p2 = pneg %p855_p7  ;;  %p861_p9 = scmp.lt.s32.totalorder %s859_s23, %s853_s19 }
 0x34c   : > { %p862_p4 = por %p861_p9, %p860_p11 }
 0x34e   : > { %p863_p6 = pnand %p862_p4, %p856_p2 }
 0x350   : > { %866 = shalt.err (!%p863_p6)
}
 0x351   : > { %s867_s14 = scalar_lea.hbm %s1354_s30, 16  ;;  %s871_s15 = scalar_lea.hbm %s1491_s6, 32 }
 0x352   : > { %p868_p12 = scmp.ne.s32.totalorder %s1354_s30, %s867_s14  ;;  %p872_p5 = scmp.lt.u32.totalorder %s1354_s30, %s1491_s6 }
 0x353   : > { %p873_p10 = scmp.lt.u32.totalorder %s871_s15, %s867_s14  ;;  %p875_p1 = scmp.lt.u32.totalorder %s867_s14, %s1354_s30 }
 0x354   : > { %p869_p13 = pnand %p868_p12, %p1492_p8 }
 0x355   : > { %p874_p0 = por %p873_p10, %p872_p5 }
 0x356   : > { %p870_p3 = pneg %p869_p13 }
 0x357   : > { %p876_p7 = por %p875_p1, %p874_p0 }
 0x359   : > { %p877_p2 = pnand %p876_p7, %p870_p3 }
 0x35b   : > { %880 = shalt.err (!%p877_p2)
}
 0x35c   : > { %635 = dma.vmem_to_hbm [thread:$0]  (%p1492_p8), %s450_s1, 16, %s1354_s30, %s433_s20  }
 0x35d   : > { %s1493_s19 = sld [smem:[#allocation26_spill]]  ;;  %s462_s11 = sshll.u32 %s314_s10, 4  ;;  %s463_s11 = int_to_ptr.vmem [resolvable:$true] %s462_s11 }
 0x35e   : > { %s437_s23 = scalar_lea.sflag [#allocation13], %s1313_s27  ;;  %s881_s14 = scalar_lea.vmem %s463_s11, 16 }
 0x35f   : > { %p882_p11 = scmp.ne.s32.totalorder %s463_s11, %s881_s14  ;;  %s1024_s2 = smov [#allocation12]  }
 0x360   : > { %s885_s16 = sshll.u32 %s1024_s2, 4  ;;  %s886_s16 = int_to_ptr.vmem [resolvable:$false] %s885_s16 }
 0x361   : > { %p883_p9 = pnand %p882_p11, %p1492_p8  ;;  %s887_s15 = scalar_lea.vmem %s886_s16, 32 }
 0x362   : > { %p888_p6 = scmp.lt.s32.totalorder %s463_s11, %s886_s16  ;;  %p889_p12 = scmp.lt.s32.totalorder %s887_s15, %s881_s14 }
 0x363   : > { %s1381_s8 = scalar_lea.hbm %s1493_s19, %s618_s17  ;;  %p884_p4 = pneg %p883_p9 }
 0x364   : > { %p890_p13 = por %p889_p12, %p888_p6 }
 0x366   : > { %p891_p3 = pnand %p890_p13, %p884_p4 }
 0x368   : > { %894 = shalt.err (!%p891_p3)
}
 0x369   : > { %s895_s26 = scalar_lea.hbm %s1381_s8, 16  ;;  %s899_s17 = scalar_lea.hbm %s1493_s19, 32 }
 0x36a   : > { %p896_p5 = scmp.ne.s32.totalorder %s1381_s8, %s895_s26  ;;  %p900_p1 = scmp.lt.u32.totalorder %s1381_s8, %s1493_s19 }
 0x36b   : > { %p901_p7 = scmp.lt.u32.totalorder %s899_s17, %s895_s26  ;;  %p903_p11 = scmp.lt.u32.totalorder %s895_s26, %s1381_s8 }
 0x36c   : > { %p897_p10 = pnand %p896_p5, %p1492_p8 }
 0x36d   : > { %p902_p2 = por %p901_p7, %p900_p1 }
 0x36e   : > { %p898_p0 = pneg %p897_p10 }
 0x36f   : > { %p904_p9 = por %p903_p11, %p902_p2 }
 0x371   : > { %p905_p4 = pnand %p904_p9, %p898_p0 }
 0x373   : > { %908 = shalt.err (!%p905_p4)
}
 0x374   : > { %636 = dma.vmem_to_hbm [thread:$0]  (%p1492_p8), %s463_s11, 16, %s1381_s8, %s437_s23  }
 0x375 PF: > { %s1494_s20 = sld [smem:[#allocation19_spill]]  ;;  %s1495_s7 = sld [smem:[#allocation21_spill]] }
 0x376   : > { %p660_p6 = scmp.ge.s32.totalorder %s1015_s29, 2 }
 0x37b   : > { %s474_s12 = sand.u32 1, %s1494_s20   ;;  %p1496_p12 = scmp.ne.s32.totalorder %s1495_s7, 0 }
 0x37c   : > { %s475_s0 = scalar_lea.sflag [#allocation7], %s474_s12 }
 0x37d   : > { %p651_p13 = pnand %p660_p6, %p1496_p12 }
 0x37f   : > { %966 = dma.done.wait (!%p651_p13), %s475_s0, 16  }
 0x380   : > { %968 = vsyncadd (!%p651_p13), %s475_s0, 4294967280  ;;  %s483_s5 = scalar_lea.sflag [#allocation13], %s474_s12 }
 0x381   : > { %970 = dma.done.wait (!%p651_p13), %s483_s5, 16  }
 0x382   : > { %972 = vsyncadd (!%p651_p13), %s483_s5, 4294967280  ;;  %s27_s29 = sadd.s32 1, %s1015_s29   ;;  %s1497_s0 = sld [smem:[#allocation20_spill]] }
 0x383   : > { %p24_p3 = scmp.ge.s32.totalorder %s27_s29, 10   ;;  %s1498_s27 = sld [smem:[#allocation22_spill]] }
 0x384   : > { %s1499_s20 = smov %s979_s21  ;;  %s1500_s21 = smov %s983_s22 }
 0x385   : > { %s1501_s22 = smov %s1277_s4  ;;  %s1502_s23 = smov %s991_s24 }
 0x386   : > { %s1503_s24 = smov %s995_s25  ;;  %s1504_s25 = smov %s1272_s9 }
 0x387   : > { %s1505_s26 = smov %s1011_s28  ;;  %s1506_s28 = smov %s1512_s18 }
 0x388   :  { %26 = sbr.rel (!%p24_p3) target bundleno = 18 (0x12), region = 131 }
 0x38f   :  { %487 = vsyncpa [#allocation6], 1 }
 0x390   :  { %489 = vsyncpa [#allocation6 + $0x1], 1 }
 0x391   :  { %490 = vsyncpa [#allocation9], 1 }
 0x392   :  { %491 = vsyncpa [#allocation7], 1 }
 0x393   :  { %493 = vsyncpa [#allocation7 + $0x1], 1 }
 0x394   :  { %494 = vsyncpa [#allocation13], 1 }
 0x395   :  { %496 = vsyncpa [#allocation13 + $0x1], 1 }

</bundles_post_ra>
